<compile_context>
chip_gen: v6e
topology: v6e:2x2x1
jax: 0.10.0
libtpu: 0.0.40
codegen_flags: <defaults>
</compile_context>

<pallas_src>
import functools

import jax
import jax.numpy as jnp
from jax.experimental import pallas as pl
from jax.experimental.pallas import tpu as pltpu


# ----------------------------- Pallas kernel -----------------------------
def block_kernel(p_ref, w_ref, o_ref, sum_ref, sq_ref, *, true_p, tp):
    # p_ref:   (1, Kdim_p, tp)    bf16 patches tile (one batch element)
    # w_ref:   (Cout_p, Kdim_p)   bf16 conv weight (im2col layout, no .T)
    # o_ref:   (1, Cout_p, P_p)   f32 output, resident across the P grid axis
    # sum_ref: (Cout_p, 1)        f32 running per-channel sum
    # sq_ref:  (Cout_p, 1)        f32 running per-channel sum of squares
    p_idx = pl.program_id(1)

    @pl.when(p_idx == 0)
    def _init():
        sum_ref[...] = jnp.zeros_like(sum_ref)
        sq_ref[...] = jnp.zeros_like(sq_ref)

    # Convolution tile on the MXU: (Cout_p, Kdim_p) @ (Kdim_p, tp) -> f32.
    y = jnp.dot(w_ref[...], p_ref[0], preferred_element_type=jnp.float32)

    # Single-pass InstanceNorm statistics (biased variance later).
    sum_ref[...] += jnp.sum(y, axis=1, keepdims=True)
    sq_ref[...] += jnp.sum(y * y, axis=1, keepdims=True)

    # Stage un-normalized conv output into the resident output block
    # (lane-dense store: P is the last / lane axis).
    start = pl.multiple_of(p_idx * tp, tp)
    o_ref[0, :, pl.ds(start, tp)] = y

    @pl.when(p_idx == pl.num_programs(1) - 1)
    def _finalize():
        inv_n = jnp.float32(1.0 / true_p)          # true (unpadded) pixel count
        mean = sum_ref[...] * inv_n                 # (Cout_p, 1)
        var = sq_ref[...] * inv_n - mean * mean     # biased variance
        scale = jax.lax.rsqrt(var + 1e-5)
        y_full = o_ref[0]                           # (Cout_p, P_p) f32
        y_norm = (y_full - mean) * scale
        o_ref[0] = jnp.where(y_norm >= 0, y_norm, 0.2 * y_norm)  # LeakyReLU(0.2)


# ------------------------------ JAX wrapper -------------------------------
def _round_up(x, m):
    return (x + m - 1) // m * m


def im2col_reflect(x, K, stride, pad):
    """x: (N, C, H, W) -> patches (N, C*K*K, Ho*Wo), plus Ho, Wo."""
    xp = jnp.pad(x, ((0, 0), (0, 0), (pad, pad), (pad, pad)), mode="reflect")
    N, C, Hp, Wp = xp.shape
    Ho = (Hp - K) // stride + 1
    Wo = (Wp - K) // stride + 1
    cols = []
    for i in range(K):
        for j in range(K):
            cols.append(
                xp[:, :, i:i + (Ho - 1) * stride + 1:stride,
                          j:j + (Wo - 1) * stride + 1:stride]
            )  # (N, C, Ho, Wo)
    p = jnp.stack(cols, axis=2)                    # (N, C, K*K, Ho, Wo)
    p = p.reshape(N, C * K * K, Ho * Wo)           # Kdim index = c*K*K + i*K + j
    return p, Ho, Wo


def block_forward(x, weight, bias, stride):
    """x: (N, Cin, H, W) NCHW.  weight: (Cout, Cin, 4, 4).  bias: (Cout,)."""
    del bias  # cancels exactly under affine=False InstanceNorm (see header note)
    K, pad = 4, 1
    N, Cin, H, W = x.shape
    Cout = weight.shape[0]

    patches, Ho, Wo = im2col_reflect(x, K, stride, pad)   # (N, Kdim, P) f32
    P = Ho * Wo
    Kdim = Cin * K * K

    # Hardware-friendly padded sizes (zero padding is exact: no bias, so padded
    # columns/rows produce exact zeros and do not perturb the statistics).
    Kdim_p = _round_up(Kdim, 8)
    Cout_p = _round_up(Cout, 8)
    tp = 512 if P >= 512 else _round_up(P, 128)   # lane tile, multiple of 128
    P_p = _round_up(P, tp)
    num_pt = P_p // tp

    patches_p = jnp.pad(
        patches, ((0, 0), (0, Kdim_p - Kdim), (0, P_p - P))
    ).astype(jnp.bfloat16)
    w2d = jnp.pad(
        weight.reshape(Cout, Kdim), ((0, Cout_p - Cout), (0, Kdim_p - Kdim))
    ).astype(jnp.bfloat16)

    # Scoped-VMEM budget: double-buffered patches tile + weight + resident
    # output block + headroom for finalize temporaries.
    vmem_bytes = int(
        4 * Kdim_p * tp * 2          # patches tile, 2 buffers + margin
        + 2 * Cout_p * Kdim_p * 2    # weight
        + 2 * Cout_p * P_p * 4       # output block (revolving over N)
        + 4 * Cout_p * P_p * 4       # finalize temporaries
        + (2 << 20)
    )
    vmem_limit = max(32 * 1024 * 1024, min(vmem_bytes, 64 * 1024 * 1024))

    kernel = functools.partial(block_kernel, true_p=P, tp=tp)

    out = pl.pallas_call(
        kernel,
        out_shape=jax.ShapeDtypeStruct((N, Cout_p, P_p), jnp.float32),
        grid_spec=pltpu.PrefetchScalarGridSpec(
            num_scalar_prefetch=0,
            grid=(N, num_pt),
            in_specs=[
                pl.BlockSpec((1, Kdim_p, tp), lambda n, p: (n, 0, p)),
                pl.BlockSpec((Cout_p, Kdim_p), lambda n, p: (0, 0)),
            ],
            out_specs=pl.BlockSpec((1, Cout_p, P_p), lambda n, p: (n, 0, 0)),
            scratch_shapes=[
                pltpu.VMEM((Cout_p, 1), jnp.float32),   # per-channel sum
                pltpu.VMEM((Cout_p, 1), jnp.float32),   # per-channel sum(x^2)
            ],
        ),
        compiler_params=pltpu.CompilerParams(
            dimension_semantics=("parallel", "arbitrary"),
            vmem_limit_bytes=vmem_limit,
        ),
    )(patches_p, w2d)

    # (N, Cout_p, P_p) -> slice off padding -> NCHW (plain reshape, no transpose).
    return out[:, :Cout, :P].reshape(N, Cout, Ho, Wo)


# --------------------------- pure-JAX reference ----------------------------
def block_reference(x, weight, bias, stride):
    xp = jnp.pad(x, ((0, 0), (0, 0), (1, 1), (1, 1)), mode="reflect")
    y = jax.lax.conv_general_dilated(
        xp, weight, window_strides=(stride, stride), padding="VALID",
        dimension_numbers=("NCHW", "OIHW", "NCHW"),
        precision=jax.lax.Precision.HIGHEST)
    y = y + bias.reshape(1, -1, 1, 1)
    mean = jnp.mean(y, axis=(2, 3), keepdims=True)
    var = jnp.mean((y - mean) ** 2, axis=(2, 3), keepdims=True)
    yn = (y - mean) * jax.lax.rsqrt(var + 1e-5)
    return jnp.where(yn >= 0, yn, 0.2 * yn)


# --------------------------------- main ------------------------------------
if __name__ == "__main__":
    key = jax.random.PRNGKey(0)
    k1, k2, k3 = jax.random.split(key, 3)

    # Small shapes consistent with the module.
    N, Cin, Cout, H, W, stride = 2, 4, 8, 16, 16, 2

    x = jax.random.normal(k1, (N, Cin, H, W), dtype=jnp.float32)
    weight = 0.1 * jax.random.normal(k2, (Cout, Cin, 4, 4), dtype=jnp.float32)
    bias = 0.1 * jax.random.normal(k3, (Cout,), dtype=jnp.float32)

    out = jax.block_until_ready(block_forward(x, weight, bias, stride))
    ref = jax.block_until_ready(block_reference(x, weight, bias, stride))

    assert out.shape == ref.shape, (out.shape, ref.shape)
    # Tolerance is loosened vs pure-f32 because the kernel feeds the MXU bf16
    # operands (f32 accumulation); normalized outputs are O(1).
    assert jnp.allclose(out, ref, rtol=5e-2, atol=5e-2), float(
        jnp.max(jnp.abs(out - ref)))

    print("KERNEL_OK")
</pallas_src>

<mosaic_0001>
module attributes {stable_mosaic.version = 11 : i64} {
  func.func @block_kernel(%arg0: i32, %arg1: i32, %arg2: memref<1x64x128xbf16, #tpu.memory_space<vmem>>, %arg3: memref<8x64xbf16, #tpu.memory_space<vmem>>, %arg4: memref<1x8x128xf32, #tpu.memory_space<vmem>>, %arg5: memref<8x1xf32, #tpu.memory_space<vmem>>, %arg6: memref<8x1xf32, #tpu.memory_space<vmem>>) attributes {dimension_semantics = [#tpu.dimension_semantics<parallel>, #tpu.dimension_semantics<arbitrary>], iteration_bounds = array<i64: 2, 1>, scalar_prefetch = 0 : i64, scratch_operands = 2 : i64, tpu.core_type = #tpu.core_type<tc>, window_params = [{transform_indices = @transform_0, window_bounds = array<i64: 1, 64, 128>}, {pipeline_mode = #tpu.pipeline_mode<synchronous>, transform_indices = @transform_1, window_bounds = array<i64: 8, 64>}, {transform_indices = @transform_2, window_bounds = array<i64: 1, 8, 128>}]} {
    %c0_i32 = arith.constant 0 : i32
    %0 = arith.cmpi eq, %arg1, %c0_i32 : i32
    %1 = arith.extui %0 : i1 to i32
    %c0_i32_0 = arith.constant 0 : i32
    %2 = arith.cmpi ne, %1, %c0_i32_0 : i32
    scf.if %2 {
      %cst_19 = arith.constant 0.000000e+00 : f32
      %27 = vector.broadcast %cst_19 : f32 to vector<8x1xf32>
      %c0_20 = arith.constant 0 : index
      %c0_21 = arith.constant 0 : index
      %28 = vector.load %arg5[%c0_20, %c0_21] : memref<8x1xf32, #tpu.memory_space<vmem>>, vector<8x1xf32>
      tpu.vector_store %arg5[%c0_20, %c0_21], %27 {strides = array<i32>} : memref<8x1xf32, #tpu.memory_space<vmem>>, vector<8x1xf32>,
      %cst_22 = arith.constant 0.000000e+00 : f32
      %29 = vector.broadcast %cst_22 : f32 to vector<8x1xf32>
      %c0_23 = arith.constant 0 : index
      %c0_24 = arith.constant 0 : index
      %30 = vector.load %arg6[%c0_23, %c0_24] : memref<8x1xf32, #tpu.memory_space<vmem>>, vector<8x1xf32>
      tpu.vector_store %arg6[%c0_23, %c0_24], %29 {strides = array<i32>} : memref<8x1xf32, #tpu.memory_space<vmem>>, vector<8x1xf32>,
    } else {
    }
    %c0 = arith.constant 0 : index
    %c0_1 = arith.constant 0 : index
    %3 = vector.load %arg3[%c0, %c0_1] : memref<8x64xbf16, #tpu.memory_space<vmem>>, vector<8x64xbf16>
    %c0_2 = arith.constant 0 : index
    %c0_3 = arith.constant 0 : index
    %c0_4 = arith.constant 0 : index
    %4 = vector.load %arg2[%c0_2, %c0_3, %c0_4] : memref<1x64x128xbf16, #tpu.memory_space<vmem>>, vector<1x64x128xbf16>
    %5 = vector.shape_cast %4 : vector<1x64x128xbf16> to vector<64x128xbf16>
    %cst = arith.constant dense<0.000000e+00> : vector<8x128xf32>
    %6 = tpu.matmul %3, %5, %cst {dimension_numbers = #tpu.dot_dimension_numbers<[1], [0], [0], [1], [0, 0, 1, 1], [], []>} : vector<8x64xbf16>, vector<64x128xbf16>, vector<8x128xf32> -> vector<8x128xf32>
    %c0_5 = arith.constant 0 : index
    %c0_6 = arith.constant 0 : index
    %7 = vector.load %arg5[%c0_5, %c0_6] : memref<8x1xf32, #tpu.memory_space<vmem>>, vector<8x1xf32>
    %cst_7 = arith.constant dense<0.000000e+00> : vector<8xf32>
    %8 = vector.multi_reduction <add>, %6, %cst_7 [1] : vector<8x128xf32> to vector<8xf32>
    %9 = vector.shape_cast %8 : vector<8xf32> to vector<8x1xf32>
    %10 = arith.addf %7, %9 : vector<8x1xf32>
    %c0_8 = arith.constant 0 : index
    %c0_9 = arith.constant 0 : index
    %11 = vector.load %arg5[%c0_8, %c0_9] : memref<8x1xf32, #tpu.memory_space<vmem>>, vector<8x1xf32>
    tpu.vector_store %arg5[%c0_8, %c0_9], %10 {strides = array<i32>} : memref<8x1xf32, #tpu.memory_space<vmem>>, vector<8x1xf32>,
    %c0_10 = arith.constant 0 : index
    %c0_11 = arith.constant 0 : index
    %12 = vector.load %arg6[%c0_10, %c0_11] : memref<8x1xf32, #tpu.memory_space<vmem>>, vector<8x1xf32>
    %13 = arith.mulf %6, %6 : vector<8x128xf32>
    %cst_12 = arith.constant dense<0.000000e+00> : vector<8xf32>
    %14 = vector.multi_reduction <add>, %13, %cst_12 [1] : vector<8x128xf32> to vector<8xf32>
    %15 = vector.shape_cast %14 : vector<8xf32> to vector<8x1xf32>
    %16 = arith.addf %12, %15 : vector<8x1xf32>
    %c0_13 = arith.constant 0 : index
    %c0_14 = arith.constant 0 : index
    %17 = vector.load %arg6[%c0_13, %c0_14] : memref<8x1xf32, #tpu.memory_space<vmem>>, vector<8x1xf32>
    tpu.vector_store %arg6[%c0_13, %c0_14], %16 {strides = array<i32>} : memref<8x1xf32, #tpu.memory_space<vmem>>, vector<8x1xf32>,
    %c128_i32 = arith.constant 128 : i32
    %18 = arith.muli %arg1, %c128_i32 : i32
    %19 = tpu.assume_multiple %18, 128 : i32
    %c0_15 = arith.constant 0 : index
    %c0_16 = arith.constant 0 : index
    %20 = arith.index_cast %19 : i32 to index
    %21 = vector.load %arg4[%c0_15, %c0_16, %20] : memref<1x8x128xf32, #tpu.memory_space<vmem>>, vector<1x8x128xf32>
    %22 = vector.shape_cast %21 : vector<1x8x128xf32> to vector<8x128xf32>
    %23 = vector.shape_cast %6 : vector<8x128xf32> to vector<1x8x128xf32>
    tpu.vector_store %arg4[%c0_15, %c0_16, %20], %23 {strides = array<i32>} : memref<1x8x128xf32, #tpu.memory_space<vmem>>, vector<1x8x128xf32>,
    %c0_i32_17 = arith.constant 0 : i32
    %24 = arith.cmpi eq, %arg1, %c0_i32_17 : i32
    %25 = arith.extui %24 : i1 to i32
    %c0_i32_18 = arith.constant 0 : i32
    %26 = arith.cmpi ne, %25, %c0_i32_18 : i32
    scf.if %26 {
      %c0_19 = arith.constant 0 : index
      %c0_20 = arith.constant 0 : index
      %27 = vector.load %arg5[%c0_19, %c0_20] : memref<8x1xf32, #tpu.memory_space<vmem>>, vector<8x1xf32>
      %cst_21 = arith.constant 1.562500e-02 : f32
      %28 = vector.broadcast %cst_21 : f32 to vector<8x1xf32>
      %29 = arith.mulf %27, %28 : vector<8x1xf32>
      %c0_22 = arith.constant 0 : index
      %c0_23 = arith.constant 0 : index
      %30 = vector.load %arg6[%c0_22, %c0_23] : memref<8x1xf32, #tpu.memory_space<vmem>>, vector<8x1xf32>
      %cst_24 = arith.constant 1.562500e-02 : f32
      %31 = vector.broadcast %cst_24 : f32 to vector<8x1xf32>
      %32 = arith.mulf %30, %31 : vector<8x1xf32>
      %33 = arith.mulf %29, %29 : vector<8x1xf32>
      %34 = arith.subf %32, %33 : vector<8x1xf32>
      %cst_25 = arith.constant 9.99999974E-6 : f32
      %35 = vector.broadcast %cst_25 : f32 to vector<8x1xf32>
      %36 = arith.addf %34, %35 : vector<8x1xf32>
      %37 = math.rsqrt %36 : vector<8x1xf32>
      %c0_26 = arith.constant 0 : index
      %c0_27 = arith.constant 0 : index
      %c0_28 = arith.constant 0 : index
      %38 = vector.load %arg4[%c0_26, %c0_27, %c0_28] : memref<1x8x128xf32, #tpu.memory_space<vmem>>, vector<1x8x128xf32>
      %39 = vector.shape_cast %38 : vector<1x8x128xf32> to vector<8x128xf32>
      %40 = vector.broadcast %29 : vector<8x1xf32> to vector<8x128xf32>
      %41 = arith.subf %39, %40 : vector<8x128xf32>
      %42 = vector.broadcast %37 : vector<8x1xf32> to vector<8x128xf32>
      %43 = arith.mulf %41, %42 : vector<8x128xf32>
      %cst_29 = arith.constant 0.000000e+00 : f32
      %44 = vector.broadcast %cst_29 : f32 to vector<8x128xf32>
      %45 = arith.cmpf oge, %43, %44 : vector<8x128xf32>
      %cst_30 = arith.constant 2.000000e-01 : f32
      %46 = vector.broadcast %cst_30 : f32 to vector<8x128xf32>
      %47 = arith.mulf %46, %43 : vector<8x128xf32>
      %48 = arith.select %45, %43, %47 : vector<8x128xi1>, vector<8x128xf32>
      %c0_31 = arith.constant 0 : index
      %c0_32 = arith.constant 0 : index
      %c0_33 = arith.constant 0 : index
      %49 = vector.load %arg4[%c0_31, %c0_32, %c0_33] : memref<1x8x128xf32, #tpu.memory_space<vmem>>, vector<1x8x128xf32>
      %50 = vector.shape_cast %49 : vector<1x8x128xf32> to vector<8x128xf32>
      %51 = vector.shape_cast %48 : vector<8x128xf32> to vector<1x8x128xf32>
      tpu.vector_store %arg4[%c0_31, %c0_32, %c0_33], %51 {strides = array<i32>} : memref<1x8x128xf32, #tpu.memory_space<vmem>>, vector<1x8x128xf32>,
    } else {
    }
    return
  }
  func.func @transform_0(%arg0: i32, %arg1: i32) -> (i32, i32, i32) {
    %c0_i32 = arith.constant 0 : i32
    %c0_i32_0 = arith.constant 0 : i32
    return %arg0, %c0_i32, %arg1 : i32, i32, i32
  }
  func.func @transform_1(%arg0: i32, %arg1: i32) -> (i32, i32) {
    %c0_i32 = arith.constant 0 : i32
    %c0_i32_0 = arith.constant 0 : i32
    %c0_i32_1 = arith.constant 0 : i32
    return %c0_i32, %c0_i32_0 : i32, i32
  }
  func.func @transform_2(%arg0: i32, %arg1: i32) -> (i32, i32, i32) {
    %c0_i32 = arith.constant 0 : i32
    %c0_i32_0 = arith.constant 0 : i32
    %c0_i32_1 = arith.constant 0 : i32
    return %arg0, %c0_i32, %c0_i32_0 : i32, i32, i32
  }
}

</mosaic_0001>

<bundles_post_ra>
// kernel: tpu_custom_call.1
= control target key start
LH: loop header
LB: loop body
LE: loop exit
PB: predicated region body
PF: predicated region fallthrough
CT: control target
= control target key end

     0   :  { %7 = vsyncpa [#allocation5], 0  ;;  %s887_s0 = inlined_call_operand.hbm [shape: bf16[2,64,128], index: 0, kind: input, shape index: {}]   ;;  %s888_s1 = inlined_call_operand.hbm [shape: bf16[8,64], index: 1, kind: input, shape index: {}]   ;;  %s889_s2 = inlined_call_operand.hbm [shape: f32[2,8,128], index: 2, kind: output, shape index: {}]  }
   0x1   :  { %9 = vsyncpa [#allocation5 + $0x1], 0 }
   0x2   :  { %10 = vsyncpa [#allocation8], 0 }
   0x3   :  { %11 = vsyncpa [#allocation6], 0 }
   0x4   :  { %13 = vsyncpa [#allocation6 + $0x1], 0  ;;  %s713_s9 = smov 0   ;;  %s715_s10 = smov 0  }
   0x5   :  { %s717_s11 = smov 0   ;;  %s719_s12 = smov 0  }
   0x6   :  { %s721_s13 = smov 0   ;;  %s723_s14 = smov 0  }
   0x7 LB: > { %s425_s15 = sadd.s32 4294967295, %s688_s14   ;;  %s426_s16 = sadd.s32 4294967294, %s688_s14   ;;  %s688_s14 = sphi %s723_s14, %s19_s14   ;;  %s684_s13 = sphi %s721_s13, %s908_s13   ;;  %s680_s12 = sphi %s719_s12, %s907_s12   ;;  %s676_s11 = sphi %s717_s11, %s906_s11   ;;  %s672_s10 = sphi %s715_s10, %s905_s10   ;;  %s668_s9 = sphi %s713_s9, %s904_s9  }
   0x8   : > { %s40_s17 = sadd.s32 1, %s676_s11  ;;  %p47_p0 = scmp.ne.s32.totalorder %s676_s11, %s672_s10 }
   0x9   : > { %p48_p1 = scmp.eq.s32.totalorder %s688_s14, 0  ;;  %p53_p2 = scmp.ne.s32.totalorder %s672_s10, %s668_s9 }
   0xa   : > { %p751_p3 = scmp.eq.s32.totalorder %s425_s15, 0  ;;  %p98_p4 = scmp.eq.s32.totalorder %s425_s15, 1 }
   0xb   : > { %p755_p5 = por %p48_p1, %p47_p0  ;;  %p104_p6 = scmp.eq.s32.totalorder %s426_s16, 1 }
   0xc   : > { %p761_p7 = por %p751_p3, %p53_p2  ;;  %p765_p8 = por %p98_p4, %p47_p0 }
   0xd   : > { %p769_p9 = por %p104_p6, %p53_p2  ;;  %p427_p10 = scmp.ge.s32.totalorder %s688_s14, 1 }
   0xe   : > { %s894_s20 = scalar_select %p761_p7, 1, 0 }
   0xf   : > { %s895_s21 = scalar_select %p765_p8, 1, 0 }
  0x10   : > { %s896_s22 = scalar_select %p769_p9, 1, 0 }
  0x11   : > { %p111_p11 = scmp.lt.s32.totalorder %s688_s14, 3  ;;  %s690_s24 = smov [#allocation7]  }
  0x12   : > { %s124_s25 = sshll.u32 %s690_s24, 4  ;;  %p485_p1 = scmp.lt.s32.totalorder %s688_s14, 2  ;;  %s125_s25 = int_to_ptr.vmem [resolvable:$true] %s124_s25 }
  0x13   : > { %p776_p13 = pnand %p427_p10, %p111_p11  ;;  %s31_s28 = sadd.s32 1, %s684_s13 }
  0x14   : > { %p785_p4 = pnand %p485_p1, %p755_p5  ;;  %p33_p6 = scmp.ge.s32.totalorder %s31_s28, 2 }
  0x15   : > { %p472_p0 = pneg %p776_p13  ;;  %s135_s29 = sand.u32 1, %s676_s11  }
  0x16   : > { %s561_s30 = scalar_lea.vmem %s125_s25, 64  ;;  %p569_p8 = scmp.lt.s32.totalorder %s125_s25, %s125_s25 }
  0x17   : > { %p791_p2 = pnand %p472_p0, %p751_p3  ;;  %p562_p11 = scmp.ne.s32.totalorder %s125_s25, %s561_s30 }
  0x18   : > { %p570_p5 = scmp.lt.s32.totalorder %s561_s30, %s561_s30 }
  0x19   : > { %p552_p10 = pneg %p791_p2 }
  0x1a   : > { %p571_p1 = por %p570_p5, %p569_p8 }
  0x1b   : > { %p564_p12 = pnand %p562_p11, %p552_p10 }
  0x1d   : > { %p565_p9 = pneg %p564_p12 }
  0x1f   : > { %p572_p7 = pnand %p571_p1, %p565_p9 }
  0x21   : > { %575 = shalt.err (!%p572_p7)
}
  0x22   : > { %475 = dma.hbm_to_vmem [thread:$0]  (!%p791_p2), %s888_s1, 64, %s125_s25, [#allocation8]  }
  0x23   : > { %s910_s28 = smov (%p33_p6, %s31_s28), 0  ;;  %s430_s5 = sshll.u32 %s135_s29, 5 }
  0x24   : > { %s35_s6 = ssub.s32 %s684_s13, %s910_s28  ;;  %s446_s7 = sshll.u32 %s684_s13, 9 }
  0x25   : > { %p38_p12 = scmp.eq.s32.totalorder %s35_s6, 0  ;;  %s146_s16 = scalar_lea.hbm %s887_s0, %s446_s7 }
  0x26   : > { %s139_s19 = scalar_lea.vmem [#allocation4], %s430_s5  ;;  %s136_s30 = scalar_lea.sflag [#allocation5], %s135_s29 }
  0x27   : > { %s147_s24 = sshll.u32 %s139_s19, 4  ;;  %p578_p7 = pneg %p785_p4  ;;  %s148_s24 = int_to_ptr.vmem [resolvable:$true] %s147_s24 }
  0x28   : > { %s815_s27 = scalar_select %p38_p12, %s676_s11, %s40_s17  }
  0x29   : > { %s589_s25 = scalar_lea.vmem %s148_s24, 512  ;;  %s691_s3 = smov [#allocation4]  }
  0x2a   : > { %p590_p8 = scmp.ne.s32.totalorder %s148_s24, %s589_s25  ;;  %s594_s4 = sshll.u32 %s691_s3, 4  ;;  %s595_s4 = int_to_ptr.vmem [resolvable:$false] %s594_s4 }
  0x2b   : > { %s596_s6 = scalar_lea.vmem %s595_s4, 1024  ;;  %p597_p2 = scmp.lt.s32.totalorder %s148_s24, %s595_s4 }
  0x2c   : > { %p592_p9 = pnand %p590_p8, %p578_p7  ;;  %p598_p6 = scmp.lt.s32.totalorder %s596_s6, %s589_s25 }
  0x2e   : > { %p593_p0 = pneg %p592_p9  ;;  %p599_p10 = por %p598_p6, %p597_p2 }
  0x30   : > { %p600_p11 = pnand %p599_p10, %p593_p0 }
  0x32   : > { %603 = shalt.err (!%p600_p11)
}
  0x33   : > { %s692_s5 = smov 64   ;;  %s693_s17 = smov 4  }
  0x34   : > { %479 = dma.hbm_to_vmem [thread:$0]  (!%p785_p4), %s146_s16, 512, %s148_s24, %s136_s30, %s692_s5, %s692_s5, %s693_s17  }
  0x35   : > { %159 = sbr.rel (%p776_p13) target bundleno = 585 (0x249), region = 28  ;;  %s824_s29 = sand.u32 (!%p776_p13), 1, %s672_s10  }
  0x36   : > { %s434_s7 = sshll.u32 (!%p776_p13), %s824_s29, 5  ;;  %s162_s8 = scalar_lea.sflag (!%p776_p13), [#allocation5], %s824_s29 }
  0x37   : > { %s165_s15 = scalar_lea.vmem (!%p776_p13), [#allocation4], %s434_s7  ;;  %p900_p5 = scmp.ne.s32.totalorder (!%p776_p13), %s894_s20, 0 }
  0x3a   : > { %655 = dma.done.wait (%p900_p5), %s162_s8, 512  }
  0x3b   : > { %657 = vsyncadd (%p900_p5), %s162_s8, 4294966784 }
  0x3c   : > { %659 = dma.done.wait (%p751_p3), [#allocation8], 64  }
  0x3d   : > { %661 = vsyncadd (%p751_p3), [#allocation8], 4294967232  ;;  %v694_v0 = vmov 0.0   ;;  %vm695_vm0 = vmmov 0   ;;  %v544_v1 = vld [vmem:[%s165_s15 + $0x18] sm:$0xff]   ;;  %v545_v2 = vld [vmem:[%s165_s15 + $0x10] sm:$0xff]  }
  0x3e   : > { %452 = vmatprep.subr.bf16.mxu0 %v694_v0  ;;  %460 = vmatprep.mubr.msk.bf16.mxu0 %vm695_vm0, %v694_v0  ;;  %v546_v3 = vld [vmem:[%s165_s15 + $0x8] sm:$0xff]   ;;  %v547_v4 = vld [vmem:[%s165_s15] sm:$0xff]   ;;  %vm231_vm1 = vcmask 523264   ;;  %vm195_vm2 = vcmask 7168   ;;  %v696_v11 = vmov 0   ;;  %s436_s18 = sshll.u32 %s824_s29, 3 }
  0x3f   : > { %453 = vmatpush3.bf16.msra.mxu0 %v544_v1  ;;  %v198_v5 = vld [vmem:[#allocation7] sm:$0xf]  ;;  %196 = vst.msk [vmem:[#allocation2] sm:$0xff] %vm195_vm2, %v694_v0  ;;  %197 = vst.msk [vmem:[#allocation3] sm:$0xff] %vm195_vm2, %v694_v0  ;;  %542 = vset.pattern.permute.xlu1 %v696_v11  ;;  %s443_s20 = sshll.u32 %s680_s12, 7  ;;  %s189_s23 = scalar_lea.vmem [#allocation9], %s436_s18 }
  0x40   : > { %454 = vmatprep.subr.bf16.mxu0 %v694_v0  ;;  %543 = vset.pattern.permute.xlu0 %v696_v11  ;;  %s334_s26 = sshll.u32 %s189_s23, 4  ;;  %s845_s24 = scalar_lea.hbm %s889_s2, %s443_s20  ;;  %s335_s26 = int_to_ptr.vmem [resolvable:$true] %s334_s26 }
  0x41   : > { %s321_s30 = scalar_lea.sflag [#allocation6], %s824_s29  ;;  %s604_s25 = scalar_lea.vmem %s335_s26, 128 }
  0x42   : > { %p605_p3 = scmp.ne.s32.totalorder %s335_s26, %s604_s25  ;;  %p901_p13 = scmp.ne.s32.totalorder %s895_s21, 0 }
  0x43   : > { %455 = vmatpush3.bf16.msra.mxu0 %v545_v2  ;;  %s697_s3 = smov [#allocation9]  }
  0x44   : > { %456 = vmatprep.subr.bf16.mxu0 %v694_v0  ;;  %p606_p4 = pnand %p605_p3, %p901_p13  ;;  %s608_s12 = sshll.u32 %s697_s3, 4  ;;  %s609_s12 = int_to_ptr.vmem [resolvable:$false] %s608_s12 }
  0x45   : > { %s610_s4 = scalar_lea.vmem %s609_s12, 256  ;;  %p611_p12 = scmp.lt.s32.totalorder %s335_s26, %s609_s12 }
  0x46   : > { %v275_v12 = vld [vmem:[#allocation2] sm:$0xff]  ;;  %v281_v15 = vld [vmem:[#allocation3] sm:$0xff]  ;;  %p607_p1 = pneg %p606_p4  ;;  %p612_p7 = scmp.lt.s32.totalorder %s610_s4, %s604_s25 }
  0x47   : > { %457 = vmatpush3.bf16.msra.mxu0 %v546_v3 }
  0x48   : > { %458 = vmatprep.subr.bf16.mxu0 %v694_v0  ;;  %p613_p8 = por %p612_p7, %p611_p12 }
  0x4a   : > { %p614_p9 = pnand %p613_p8, %p607_p1 }
  0x4b   : > { %459 = vmatpush3.bf16.msra.mxu0 %v547_v4 }
  0x4e   : > { %461 = vmatmul.mubr.msk.bf16.vlgmr.msra.gmra.mxu0 %vm231_vm1, %v198_v5 }
 0x10e   : > { %v269_v6 = vpop.f32.mrf.mxu0 }
 0x10f   : > { %276 = vadd.xlane.f32.xlu0 %v269_v6  ;;  %v282_v8 = vmul.f32 %v269_v6, %v269_v6 }
 0x110   : > { %v462_v7 = vpop.f32.mrf.mxu0 }
 0x112   : > { %v272_v9 = vpop.f32.mrf.mxu0 }
 0x113   : > { %283 = vadd.xlane.f32.xlu0 %v282_v8 }
 0x114   : > { %v463_v10 = vpop.f32.mrf.mxu0 }
 0x198   : > { %v277_v13 = vpop.xlane.xlu0 %276 }
 0x199   : > { %v278_v14 = vadd.f32 %v277_v13, %v275_v12 }
 0x19b   : > { %280 = vst.msk [vmem:[#allocation2] sm:$0xff] %vm195_vm2, %v278_v14 }
 0x19c   : > { %v284_v16 = vpop.xlane.xlu0 %283 }
 0x19d   : > { %v285_v17 = vadd.f32 %v284_v16, %v281_v15 }
 0x19f   : > { %286 = vst.msk [vmem:[#allocation3] sm:$0xff] %vm195_vm2, %v285_v17 }
 0x1a2   : > { %v295_v18 = vld [vmem:[#allocation2] sm:$0xff] }
 0x1a3   : > { %v296_v19 = vmul.f32 0.015625, %v295_v18 }
 0x1a5   : > { %306 = vperm.xlu1 %542, %v296_v19   ;;  %v299_v22 = vmul.f32 %v296_v19, %v296_v19 }
 0x1a6   : > { %v297_v20 = vld [vmem:[#allocation3] sm:$0xff] }
 0x1a7   : > { %v298_v21 = vmul.f32 0.015625, %v297_v20 }
 0x1a9   : > { %v300_v23 = vsub.f32 %v298_v21, %v299_v22 }
 0x1ab   : > { %v301_v24 = vadd.f32 1e-05, %v300_v23 }
 0x1ad   : > { %548 = vrsqrt.f32 %v301_v24 }
 0x1ba   : > { %v549_v25 = vpop.eup %548 }
 0x1bb   : > { %312 = vperm.xlu1 %542, %v549_v25  }
 0x220   : > { %v307_v26 = vpop.permute.xlu1 %306 }
 0x221   : > { %v309_v27 = vsub.f32 %v269_v6, %v307_v26 }
 0x236   : > { %v313_v28 = vpop.permute.xlu1 %312 }
 0x237   : > { %v315_v29 = vmul.f32 %v313_v28, %v309_v27 }
 0x239   : > { %vm316_vm3 = vcmp.ge.f32.partialorder %v315_v29, 0.0  ;;  %v317_v30 = vmul.f32 0.2, %v315_v29 }
 0x23b   : > { %v318_v31 = vsel %vm316_vm3, %v315_v29, %v317_v30 }
 0x23c   : > { %319 = vst [vmem:[%s189_s23] sm:$0xff] %v318_v31 }
 0x23d   : > { %617 = shalt.err (!%p614_p9)
}
 0x23e   : > { %s618_s6 = scalar_lea.hbm %s845_s24, 128  ;;  %s622_s29 = scalar_lea.hbm %s889_s2, 256 }
 0x23f   : > { %p619_p0 = scmp.ne.s32.totalorder %s845_s24, %s618_s6  ;;  %p623_p10 = scmp.lt.s32.totalorder %s845_s24, %s889_s2 }
 0x240   : > { %p624_p11 = scmp.lt.s32.totalorder %s622_s29, %s618_s6 }
 0x241   : > { %p620_p2 = pnand %p619_p0, %p901_p13 }
 0x242   : > { %p625_p5 = por %p624_p11, %p623_p10 }
 0x243   : > { %p621_p6 = pneg %p620_p2 }
 0x245   : > { %p626_p3 = pnand %p625_p5, %p621_p6 }
 0x247   : > { %629 = shalt.err (!%p626_p3)
}
 0x248   : > { %470 = dma.vmem_to_hbm [thread:$0]  (%p901_p13), %s335_s26, 128, %s845_s24, %s321_s30  }
 0x249 PF: > { %s346_s15 = sand.u32 1, %s668_s9   ;;  %p902_p4 = scmp.ne.s32.totalorder %s896_s22, 0 }
 0x24a   : > { %p903_p1 = scmp.ge.s32.totalorder %s688_s14, 2  ;;  %s347_s18 = scalar_lea.sflag [#allocation6], %s346_s15 }
 0x24c   : > { %p481_p12 = pnand %p903_p1, %p902_p4 }
 0x24e   : > { %p482_p7 = pneg %p481_p12 }
 0x250   : > { %663 = dma.done.wait (%p482_p7), %s347_s18, 128  }
 0x251   : > { %665 = vsyncadd (%p482_p7), %s347_s18, 4294967168  ;;  %s19_s14 = sadd.s32 1, %s688_s14   ;;  %s904_s9 = smov %s672_s10 }
 0x252   : > { %p16_p8 = scmp.ge.s32.totalorder %s19_s14, 4   ;;  %s905_s10 = smov %s676_s11 }
 0x253   : > { %s906_s11 = smov %s815_s27  ;;  %s907_s12 = smov %s684_s13 }
 0x254   : > { %s908_s13 = smov %s910_s28  ;;  %18 = sbr.rel (!%p16_p8) target bundleno = 7 (0x7), region = 86 }
 0x259   :  { %352 = vsyncpa [#allocation5], 1 }
 0x25a   :  { %354 = vsyncpa [#allocation5 + $0x1], 1 }
 0x25b   :  { %355 = vsyncpa [#allocation8], 1 }
 0x25c   :  { %356 = vsyncpa [#allocation6], 1 }
 0x25d   :  { %358 = vsyncpa [#allocation6 + $0x1], 1 }

</bundles_post_ra>
